<compile_context>
chip_gen: v6e
topology: v6e:2x2x1
jax: 0.10.0
libtpu: 0.0.40
codegen_flags: <defaults>
</compile_context>

<pallas_src>
import numpy as np
import jax
import jax.numpy as jnp
from jax.experimental import pallas as pl
from jax.experimental.pallas import tpu as pltpu

LANE = 128      # vreg lane width (last dim)
SUBLANE = 8     # vreg sublane count (second-to-last dim)


def _round_up(x, m):
    return ((x + m - 1) // m) * m


# ----------------------------- Pallas kernel -------------------------------
def policy_mlp_kernel(s_ref, w1_ref, b1_ref, w2_ref, b2_ref, bound_ref, o_ref):
    """Fused: (x @ W1 + b1) -> ReLU -> (@ W2 + b2) -> tanh -> * action_bound.

    Matmul inputs are bf16, accumulation + epilogue are f32.
    """
    h = jnp.dot(s_ref[...], w1_ref[...], preferred_element_type=jnp.float32)
    h = jnp.maximum(h + b1_ref[...], 0.0)                       # f32 bias + ReLU
    y = jnp.dot(h.astype(w2_ref.dtype), w2_ref[...],
                preferred_element_type=jnp.float32)
    y = jnp.tanh(y + b2_ref[...])                               # f32 bias + tanh (EUP)
    o_ref[...] = (y * bound_ref[...]).astype(o_ref.dtype)       # scale by action_bound


# ----------------------- One-time parameter prep ----------------------------
def prepare_params(raw, state_shape, action_shape, action_bound):
    """Transpose, zero-pad to lane-aligned shapes, and cast weights to bf16.

    Done once (outside the hot forward path) so the forward emits no extra
    transpose/reshape XLA ops per call.
    """
    in_dim = int(np.prod(state_shape))
    act_dim = int(np.prod(action_shape))
    hidden = raw["w1"].shape[0]
    h_pad = _round_up(hidden, LANE)
    a_pad = _round_up(act_dim, LANE)

    w1_t = jnp.zeros((in_dim, h_pad), jnp.bfloat16)
    w1_t = w1_t.at[:, :hidden].set(raw["w1"].T.astype(jnp.bfloat16))
    b1 = jnp.zeros((1, h_pad), jnp.float32).at[:, :hidden].set(
        raw["b1"].reshape(1, -1).astype(jnp.float32))

    w2_t = jnp.zeros((h_pad, a_pad), jnp.bfloat16)
    w2_t = w2_t.at[:hidden, :act_dim].set(raw["w2"].T.astype(jnp.bfloat16))
    b2 = jnp.zeros((1, a_pad), jnp.float32).at[:, :act_dim].set(
        raw["b2"].reshape(1, -1).astype(jnp.float32))

    bound = jnp.broadcast_to(jnp.asarray(action_bound, jnp.float32),
                             action_shape).reshape(1, act_dim)
    bound_p = jnp.zeros((1, a_pad), jnp.float32).at[:, :act_dim].set(bound)

    return {"w1_t": w1_t, "b1": b1, "w2_t": w2_t, "b2": b2, "bound": bound_p,
            "in_dim": in_dim, "act_dim": act_dim, "h_pad": h_pad, "a_pad": a_pad}


# ------------------------------ Forward ------------------------------------
def deterministic_policy_forward(s, prep, state_shape, action_shape, tm_max=512):
    """Mirrors DeterministicPolicyNetwork.forward for a 1D state_shape."""
    in_dim = prep["in_dim"]
    act_dim = prep["act_dim"]
    h_pad = prep["h_pad"]
    a_pad = prep["a_pad"]

    s2d = jnp.reshape(s, (-1, in_dim)).astype(jnp.bfloat16)   # stream bf16 activations
    batch = s2d.shape[0]

    # Batch tile: multiple of 8 sublanes, capped at tm_max rows (fits v7x 64MiB VMEM).
    tm = min(tm_max, _round_up(batch, SUBLANE))
    b_pad = _round_up(batch, tm)
    if b_pad != batch:
        s2d = jnp.pad(s2d, ((0, b_pad - batch), (0, 0)))
    grid = (b_pad // tm,)

    out = pl.pallas_call(
        policy_mlp_kernel,
        out_shape=jax.ShapeDtypeStruct((b_pad, a_pad), jnp.float32),
        grid=grid,
        in_specs=[
            pl.BlockSpec((tm, in_dim), lambda i: (i, 0)),        # activations: streamed per tile
            pl.BlockSpec((in_dim, h_pad), lambda i: (0, 0)),     # W1^T  (resident)
            pl.BlockSpec((1, h_pad), lambda i: (0, 0)),          # b1    (resident)
            pl.BlockSpec((h_pad, a_pad), lambda i: (0, 0)),      # W2^T  (resident)
            pl.BlockSpec((1, a_pad), lambda i: (0, 0)),          # b2    (resident)
            pl.BlockSpec((1, a_pad), lambda i: (0, 0)),          # action_bound (resident)
        ],
        out_specs=pl.BlockSpec((tm, a_pad), lambda i: (i, 0)),   # lane-dense store
        compiler_params=pltpu.CompilerParams(
            dimension_semantics=("parallel",),                   # shard batch tiles across TCs
            vmem_limit_bytes=32 * 1024 * 1024),
    )(s2d, prep["w1_t"], prep["b1"], prep["w2_t"], prep["b2"], prep["bound"])

    out = out[:batch, :act_dim]                                  # drop pad rows / pad lanes
    return jnp.reshape(out, (-1, *action_shape))


# -------------------------- Parameter init ---------------------------------
def init_params(key, in_dim, hidden_dim, act_dim):
    """Deterministic PyTorch-like (Kaiming-uniform-ish) Linear init."""
    k1, k2, k3, k4 = jax.random.split(key, 4)
    bound1 = 1.0 / np.sqrt(in_dim)
    bound2 = 1.0 / np.sqrt(hidden_dim)
    return {
        "w1": jax.random.uniform(k1, (hidden_dim, in_dim), jnp.float32, -bound1, bound1),
        "b1": jax.random.uniform(k2, (hidden_dim,), jnp.float32, -bound1, bound1),
        "w2": jax.random.uniform(k3, (act_dim, hidden_dim), jnp.float32, -bound2, bound2),
        "b2": jax.random.uniform(k4, (act_dim,), jnp.float32, -bound2, bound2),
    }


# TODO(synk): the 3D-state branch (CNNNetwork -> MLP) and >1 hidden layer are
# not implemented because CNNNetwork's definition was not provided; only the
# default hidden_dims=(128,) MLP path is fused here.

if __name__ == "__main__":
    # Small shapes consistent with the module: 1D state, default hidden_dims=(128,).
    state_shape = (16,)
    action_shape = (4,)
    action_bound = 2.0
    hidden_dim = 128
    batch = 2

    key = jax.random.PRNGKey(0)
    k_params, k_input = jax.random.split(key)
    raw = init_params(k_params, int(np.prod(state_shape)), hidden_dim,
                      int(np.prod(action_shape)))
    prep = prepare_params(raw, state_shape, action_shape, action_bound)

    s = jax.random.normal(k_input, (batch, *state_shape), dtype=jnp.float32)

    out = deterministic_policy_forward(s, prep, state_shape, action_shape)
    out = jax.block_until_ready(out)

    # Pure-JAX f32 reference (same math as the PyTorch module).
    x = jnp.reshape(s, (-1, int(np.prod(state_shape))))
    h = jnp.maximum(x @ raw["w1"].T + raw["b1"], 0.0)
    y = jnp.tanh(h @ raw["w2"].T + raw["b2"])
    ref = jnp.reshape(y, (-1, *action_shape)) * action_bound

    assert out.shape == (batch, *action_shape)
    np.testing.assert_allclose(np.asarray(out), np.asarray(ref), rtol=2e-2, atol=2e-2)

    print("KERNEL_OK")
</pallas_src>

<mosaic_0001>
module attributes {stable_mosaic.version = 11 : i64} {
  func.func @policy_mlp_kernel(%arg0: i32, %arg1: memref<8x16xbf16, #tpu.memory_space<vmem>>, %arg2: memref<16x128xbf16, #tpu.memory_space<vmem>>, %arg3: memref<1x128xf32, #tpu.memory_space<vmem>>, %arg4: memref<128x128xbf16, #tpu.memory_space<vmem>>, %arg5: memref<1x128xf32, #tpu.memory_space<vmem>>, %arg6: memref<1x128xf32, #tpu.memory_space<vmem>>, %arg7: memref<8x128xf32, #tpu.memory_space<vmem>>) attributes {dimension_semantics = [#tpu.dimension_semantics<parallel>], iteration_bounds = array<i64: 1>, scalar_prefetch = 0 : i64, scratch_operands = 0 : i64, tpu.core_type = #tpu.core_type<tc>, window_params = [{transform_indices = @transform_0, window_bounds = array<i64: 8, 16>}, {pipeline_mode = #tpu.pipeline_mode<synchronous>, transform_indices = @transform_1, window_bounds = array<i64: 16, 128>}, {pipeline_mode = #tpu.pipeline_mode<synchronous>, transform_indices = @transform_2, window_bounds = array<i64: 1, 128>}, {pipeline_mode = #tpu.pipeline_mode<synchronous>, transform_indices = @transform_3, window_bounds = array<i64: 128, 128>}, {pipeline_mode = #tpu.pipeline_mode<synchronous>, transform_indices = @transform_4, window_bounds = array<i64: 1, 128>}, {pipeline_mode = #tpu.pipeline_mode<synchronous>, transform_indices = @transform_5, window_bounds = array<i64: 1, 128>}, {transform_indices = @transform_6, window_bounds = array<i64: 8, 128>}]} {
    %c0 = arith.constant 0 : index
    %c0_0 = arith.constant 0 : index
    %0 = vector.load %arg1[%c0, %c0_0] : memref<8x16xbf16, #tpu.memory_space<vmem>>, vector<8x16xbf16>
    %c0_1 = arith.constant 0 : index
    %c0_2 = arith.constant 0 : index
    %1 = vector.load %arg2[%c0_1, %c0_2] : memref<16x128xbf16, #tpu.memory_space<vmem>>, vector<16x128xbf16>
    %cst = arith.constant dense<0.000000e+00> : vector<8x128xf32>
    %2 = tpu.matmul %0, %1, %cst {dimension_numbers = #tpu.dot_dimension_numbers<[1], [0], [0], [1], [0, 0, 1, 1], [], []>} : vector<8x16xbf16>, vector<16x128xbf16>, vector<8x128xf32> -> vector<8x128xf32>
    %c0_3 = arith.constant 0 : index
    %c0_4 = arith.constant 0 : index
    %3 = vector.load %arg3[%c0_3, %c0_4] : memref<1x128xf32, #tpu.memory_space<vmem>>, vector<1x128xf32>
    %4 = vector.broadcast %3 : vector<1x128xf32> to vector<8x128xf32>
    %5 = arith.addf %2, %4 : vector<8x128xf32>
    %cst_5 = arith.constant 0.000000e+00 : f32
    %6 = vector.broadcast %cst_5 : f32 to vector<8x128xf32>
    %7 = arith.maximumf %5, %6 : vector<8x128xf32>
    %8 = arith.truncf %7 : vector<8x128xf32> to vector<8x128xbf16>
    %c0_6 = arith.constant 0 : index
    %c0_7 = arith.constant 0 : index
    %9 = vector.load %arg4[%c0_6, %c0_7] : memref<128x128xbf16, #tpu.memory_space<vmem>>, vector<128x128xbf16>
    %cst_8 = arith.constant dense<0.000000e+00> : vector<8x128xf32>
    %10 = tpu.matmul %8, %9, %cst_8 {dimension_numbers = #tpu.dot_dimension_numbers<[1], [0], [0], [1], [0, 0, 1, 1], [], []>} : vector<8x128xbf16>, vector<128x128xbf16>, vector<8x128xf32> -> vector<8x128xf32>
    %c0_9 = arith.constant 0 : index
    %c0_10 = arith.constant 0 : index
    %11 = vector.load %arg5[%c0_9, %c0_10] : memref<1x128xf32, #tpu.memory_space<vmem>>, vector<1x128xf32>
    %12 = vector.broadcast %11 : vector<1x128xf32> to vector<8x128xf32>
    %13 = arith.addf %10, %12 : vector<8x128xf32>
    %14 = math.tanh %13 : vector<8x128xf32>
    %c0_11 = arith.constant 0 : index
    %c0_12 = arith.constant 0 : index
    %15 = vector.load %arg6[%c0_11, %c0_12] : memref<1x128xf32, #tpu.memory_space<vmem>>, vector<1x128xf32>
    %16 = vector.broadcast %15 : vector<1x128xf32> to vector<8x128xf32>
    %17 = arith.mulf %14, %16 : vector<8x128xf32>
    %c0_13 = arith.constant 0 : index
    %c0_14 = arith.constant 0 : index
    %18 = vector.load %arg7[%c0_13, %c0_14] : memref<8x128xf32, #tpu.memory_space<vmem>>, vector<8x128xf32>
    tpu.vector_store %arg7[%c0_13, %c0_14], %17 {strides = array<i32>} : memref<8x128xf32, #tpu.memory_space<vmem>>, vector<8x128xf32>,
    return
  }
  func.func @transform_0(%arg0: i32) -> (i32, i32) {
    %c0_i32 = arith.constant 0 : i32
    %c0_i32_0 = arith.constant 0 : i32
    return %arg0, %c0_i32 : i32, i32
  }
  func.func @transform_1(%arg0: i32) -> (i32, i32) {
    %c0_i32 = arith.constant 0 : i32
    %c0_i32_0 = arith.constant 0 : i32
    %c0_i32_1 = arith.constant 0 : i32
    return %c0_i32, %c0_i32_0 : i32, i32
  }
  func.func @transform_2(%arg0: i32) -> (i32, i32) {
    %c0_i32 = arith.constant 0 : i32
    %c0_i32_0 = arith.constant 0 : i32
    %c0_i32_1 = arith.constant 0 : i32
    return %c0_i32, %c0_i32_0 : i32, i32
  }
  func.func @transform_3(%arg0: i32) -> (i32, i32) {
    %c0_i32 = arith.constant 0 : i32
    %c0_i32_0 = arith.constant 0 : i32
    %c0_i32_1 = arith.constant 0 : i32
    return %c0_i32, %c0_i32_0 : i32, i32
  }
  func.func @transform_4(%arg0: i32) -> (i32, i32) {
    %c0_i32 = arith.constant 0 : i32
    %c0_i32_0 = arith.constant 0 : i32
    %c0_i32_1 = arith.constant 0 : i32
    return %c0_i32, %c0_i32_0 : i32, i32
  }
  func.func @transform_5(%arg0: i32) -> (i32, i32) {
    %c0_i32 = arith.constant 0 : i32
    %c0_i32_0 = arith.constant 0 : i32
    %c0_i32_1 = arith.constant 0 : i32
    return %c0_i32, %c0_i32_0 : i32, i32
  }
  func.func @transform_6(%arg0: i32) -> (i32, i32) {
    %c0_i32 = arith.constant 0 : i32
    %c0_i32_0 = arith.constant 0 : i32
    return %arg0, %c0_i32 : i32, i32
  }
}

</mosaic_0001>

<bundles_post_ra>
// kernel: tpu_custom_call.1
= control target key start
LH: loop header
LB: loop body
LE: loop exit
PB: predicated region body
PF: predicated region fallthrough
CT: control target
= control target key end

     0   :  { %11 = vsyncpa [#allocation3], 0  ;;  %s482_s0 = inlined_call_operand.hbm [shape: bf16[8,16], index: 0, kind: input, shape index: {}]   ;;  %s483_s1 = inlined_call_operand.hbm [shape: bf16[16,128], index: 1, kind: input, shape index: {}]   ;;  %s484_s2 = inlined_call_operand.vmem [shape: f32[1,128], index: 2, kind: input, shape index: {}]   ;;  %s485_s3 = inlined_call_operand.hbm [shape: bf16[128,128], index: 3, kind: input, shape index: {}]   ;;  %s486_s4 = inlined_call_operand.vmem [shape: f32[1,128], index: 4, kind: input, shape index: {}]   ;;  %s487_s5 = inlined_call_operand.vmem [shape: f32[1,128], index: 5, kind: input, shape index: {}]   ;;  %s488_s6 = inlined_call_operand.hbm [shape: f32[8,128], index: 6, kind: output, shape index: {}]  }
   0x1   :  { %12 = vsyncpa [#allocation6], 0 }
   0x2   :  { %13 = vsyncpa [#allocation4], 0  ;;  %s418_s21 = smov [#allocation5]  }
   0x3   :  { %s29_s22 = sshll.u32 %s418_s21, 4  ;;  %s30_s22 = int_to_ptr.vmem [resolvable:$true] %s29_s22 }
   0x4   :  { %s340_s23 = scalar_lea.vmem %s30_s22, 128  ;;  %p345_p1 = scmp.lt.s32.totalorder %s30_s22, %s30_s22 }
   0x5   :  { %p341_p0 = scmp.ne.s32.totalorder %s30_s22, %s340_s23  ;;  %p346_p2 = scmp.lt.s32.totalorder %s340_s23, %s340_s23 }
   0x7   :  { %p347_p3 = por %p346_p2, %p345_p1 }
   0x9   :  { %p348_p4 = pnand %p347_p3, %p341_p0 }
   0xb   :  { %351 = shalt.err (!%p348_p4)
}
   0xc   :  { %s419_s24 = smov 64   ;;  %s420_s25 = smov 4  }
   0xd   :  { %35 = dma.hbm_to_vmem [thread:$0]  %s483_s1, 128, %s30_s22, [#allocation6], %s419_s24, %s419_s24, %s420_s25  }
   0xe   :  { %s421_s28 = smov [#allocation2]   ;;  %s422_s30 = smov [#allocation7]  }
   0xf   :  { %s20_s29 = sshll.u32 %s421_s28, 4  ;;  %s43_s7 = sshll.u32 %s422_s30, 4  ;;  %s21_s29 = int_to_ptr.vmem [resolvable:$true] %s20_s29  ;;  %s44_s7 = int_to_ptr.vmem [resolvable:$true] %s43_s7 }
  0x10   :  { %s360_s8 = scalar_lea.vmem %s21_s29, 64  ;;  %p365_p6 = scmp.lt.s32.totalorder %s21_s29, %s21_s29 }
  0x11   :  { %p361_p5 = scmp.ne.s32.totalorder %s21_s29, %s360_s8  ;;  %p366_p7 = scmp.lt.s32.totalorder %s360_s8, %s360_s8 }
  0x13   :  { %p367_p8 = por %p366_p7, %p365_p6 }
  0x15   :  { %p368_p9 = pnand %p367_p8, %p361_p5 }
  0x17   :  { %371 = shalt.err (!%p368_p9)
}
  0x18   :  { %23 = dma.hbm_to_vmem [thread:$0]  %s482_s0, 64, %s21_s29, [#allocation3]  }
  0x19   :  { %s380_s11 = scalar_lea.vmem %s44_s7, 1024  ;;  %p385_p11 = scmp.lt.s32.totalorder %s44_s7, %s44_s7 }
  0x1a   :  { %p381_p10 = scmp.ne.s32.totalorder %s44_s7, %s380_s11  ;;  %p386_p12 = scmp.lt.s32.totalorder %s380_s11, %s380_s11 }
  0x1c   :  { %p387_p13 = por %p386_p12, %p385_p11 }
  0x1e   :  { %p388_p0 = pnand %p387_p13, %p381_p10 }
  0x20   :  { %391 = shalt.err (!%p388_p0)
}
  0x21   :  { %49 = dma.hbm_to_vmem [thread:$0]  %s485_s3, 1024, %s44_s7, [#allocation6], %s419_s24, %s419_s24, %s420_s25  }
  0x22   :  { %412 = dma.done.wait [#allocation3], 64  }
  0x23   :  { %413 = vsyncadd [#allocation3], 4294967232 }
  0x24   :  { %414 = dma.done.wait [#allocation6], 1152  }
  0x25   :  { %415 = vsyncadd [#allocation6], 4294966144  ;;  %v423_v0 = vmov 0.0   ;;  %vm424_vm0 = vmmov 0   ;;  %v321_v1 = vld [vmem:[#allocation5] sm:$0xff]   ;;  %vm80_vm1 = vcmask 130048  }
  0x26   :  { %287 = vmatprep.subr.bf16.mxu0 %v423_v0  ;;  %289 = vmatprep.mubr.msk.bf16.mxu0 %vm424_vm0, %v423_v0  ;;  %v64_v2 = vld [vmem:[#allocation2] sm:$0xf]  ;;  %v322_v3 = vld [vmem:[#allocation7 + $0x38] sm:$0xff]   ;;  %v324_v5 = vld [vmem:[#allocation7 + $0x28] sm:$0xff]   ;;  %s425_s16 = smov [#allocation8]  }
  0x27   :  { %293 = vmatprep.subr.bf16.mxu1 %v423_v0  ;;  %309 = vmatprep.mubr.msk.bf16.mxu1 %vm424_vm0, %v423_v0  ;;  %v323_v4 = vld [vmem:[#allocation7 + $0x30] sm:$0xff]   ;;  %v325_v6 = vld [vmem:[#allocation7 + $0x20] sm:$0xff]   ;;  %v326_v7 = vld [vmem:[#allocation7 + $0x18] sm:$0xff]   ;;  %s253_s17 = sshll.u32 %s425_s16, 4  ;;  %s254_s17 = int_to_ptr.vmem [resolvable:$true] %s253_s17 }
  0x28   :  { %288 = vmatpush3.bf16.msra.mxu0 %v321_v1  ;;  %294 = vmatpush3.bf16.msra.mxu1 %v322_v3  ;;  %v327_v8 = vld [vmem:[#allocation7 + $0x10] sm:$0xff]   ;;  %v328_v9 = vld [vmem:[#allocation7 + $0x8] sm:$0xff]   ;;  %v329_v10 = vld [vmem:[#allocation7] sm:$0xff]   ;;  %s392_s18 = scalar_lea.vmem %s254_s17, 128  ;;  %p397_p2 = scmp.lt.s32.totalorder %s254_s17, %s254_s17 }
  0x29   :  { %295 = vmatprep.subr.bf16.mxu1 %v423_v0  ;;  %v263_v11 = vld [vmem:[%s484_s2] ss:$0 sm:$0xff]  ;;  %p393_p1 = scmp.ne.s32.totalorder %s254_s17, %s392_s18  ;;  %p398_p3 = scmp.lt.s32.totalorder %s392_s18, %s392_s18 }
  0x2a   :  { %v266_v19 = vld [vmem:[%s486_s4] ss:$0 sm:$0xff] }
  0x2b   :  { %290 = vmatmul.mubr.msk.bf16.vlgmr.msra.gmra.mxu0 %vm80_vm1, %v64_v2  ;;  %v275_v25 = vld [vmem:[%s487_s5] ss:$0 sm:$0xff]  ;;  %p399_p4 = por %p398_p3, %p397_p2 }
  0x2c   :  { %296 = vmatpush3.bf16.msra.mxu1 %v323_v4 }
  0x2d   :  { %297 = vmatprep.subr.bf16.mxu1 %v423_v0  ;;  %p400_p5 = pnand %p399_p4, %p393_p1 }
  0x30   :  { %298 = vmatpush3.bf16.msra.mxu1 %v324_v5 }
  0x31   :  { %299 = vmatprep.subr.bf16.mxu1 %v423_v0 }
  0x34   :  { %300 = vmatpush3.bf16.msra.mxu1 %v325_v6 }
  0x35   :  { %301 = vmatprep.subr.bf16.mxu1 %v423_v0 }
  0x38   :  { %302 = vmatpush3.bf16.msra.mxu1 %v326_v7 }
  0x39   :  { %303 = vmatprep.subr.bf16.mxu1 %v423_v0 }
  0x3c   :  { %304 = vmatpush3.bf16.msra.mxu1 %v327_v8 }
  0x3d   :  { %305 = vmatprep.subr.bf16.mxu1 %v423_v0 }
  0x40   :  { %306 = vmatpush3.bf16.msra.mxu1 %v328_v9 }
  0x41   :  { %307 = vmatprep.subr.bf16.mxu1 %v423_v0 }
  0x44   :  { %308 = vmatpush3.bf16.msra.mxu1 %v329_v10 }
  0xeb   :  { %v118_v12 = vpop.f32.mrf.mxu0 }
  0xec   :  { %v119_v13 = vadd.f32 %v263_v11, %v118_v12 }
  0xed   :  { %v291_v14 = vpop.f32.mrf.mxu0 }
  0xee   :  { %v124_v15 = vmax.f32 %v119_v13, 0.0 }
  0xef   :  { %v121_v16 = vpop.f32.mrf.mxu0 }
  0xf0   :  { %v125_v17 = vpack.c.bf16 %v124_v15, %v124_v15 }
  0xf1   :  { %v292_v18 = vpop.f32.mrf.mxu0 }
  0xf2   :  { %310 = vmatmul.mubr.bf16.vlgmr.msra.gmra.mxu1 %v125_v17 }
 0x1b2   :  { %v231_v20 = vpop.f32.mrf.mxu1 }
 0x1b3   :  { %v232_v21 = vadd.f32 %v266_v19, %v231_v20 }
 0x1b4   :  { %v311_v22 = vpop.f32.mrf.mxu1 }
 0x1b5   :  { %330 = vtanh.f32 %v232_v21 }
 0x1b6   :  { %v234_v23 = vpop.f32.mrf.mxu1 }
 0x1b8   :  { %v312_v24 = vpop.f32.mrf.mxu1 }
 0x1c2   :  { %v331_v26 = vpop.eup %330 }
 0x1c3   :  { %v245_v27 = vmul.f32 %v331_v26, %v275_v25 }
 0x1c5   :  { %246 = vst [vmem:[#allocation8] sm:$0xff] %v245_v27 }
 0x1c6   :  { %403 = shalt.err (!%p400_p5)
}
 0x1c7   :  { %256 = dma.vmem_to_hbm [thread:$0]  %s254_s17, 128, %s488_s6, [#allocation4]  }
 0x1c8   :  { %416 = dma.done.wait [#allocation4], 128  }
 0x1c9   :  { %417 = vsyncadd [#allocation4], 4294967168 }
 0x1ca   :  { %260 = vsyncpa [#allocation3], 1 }
 0x1cb   :  { %261 = vsyncpa [#allocation6], 1 }
 0x1cc   :  { %262 = vsyncpa [#allocation4], 1 }

</bundles_post_ra>
